<compile_context>
chip_gen: v6e
topology: v6e:2x2x1
jax: 0.10.0
libtpu: 0.0.40
codegen_flags: <defaults>
</compile_context>

<pallas_src>
import jax
import jax.numpy as jnp
from jax.experimental import pallas as pl
from jax.experimental.pallas import tpu as pltpu


def _round_up(x, m):
    return ((x + m - 1) // m) * m


def _round_down(x, m):
    return (x // m) * m


def adj_decoder_kernel(x_ref, w1_ref, b1_ref, w2_ref, b2_ref, left_ref, right_ref):
    F = left_ref.shape[-1]
    # Stage 1: [tb, F] @ [F, H] on the MXU; f32 accumulation, f32 bias + tanh.
    h = jnp.dot(x_ref[...], w1_ref[...], preferred_element_type=jnp.float32)
    h = jnp.tanh(h + b1_ref[...])                                    # b1 is f32
    # Stage 2: fused left||right projection at its natural width 2F, one bias+tanh.
    y = jnp.dot(h.astype(w2_ref.dtype), w2_ref[...],
                preferred_element_type=jnp.float32)                  # [tb, 2F] f32
    y = jnp.tanh(y + b2_ref[...])                                    # b2 is f32
    left_ref[...] = y[:, :F].astype(left_ref.dtype)
    right_ref[...] = y[:, F:].astype(right_ref.dtype)


def _vmem_budget_bytes():
    """Scoped-VMEM budget per generation: 64 MiB on v5e/v6e (128 MiB physical),
    32 MiB on v7x (64 MiB physical per TensorCore)."""
    try:
        phys = int(pltpu.get_tpu_info().vmem_capacity_bytes)
    except Exception:
        phys = 64 * 1024 * 1024          # conservative fallback == v7x per-TC physical
    return min(phys // 2, 64 * 1024 * 1024)


def _pick_tile_rows(B, F, H, x_bytes, w_bytes, vmem_budget, max_block_b):
    """Largest batch tile whose double-buffered I/O + f32 intermediates fit the
    VMEM budget, capped so large batches still give >= 2 grid steps (v7x cores)."""
    io_per_row = 2 * (F + 2 * F) * x_bytes            # x + left + right, double-buffered
    scratch_per_row = 4 * H + w_bytes * H + 4 * (2 * F)   # h (f32), h cast, y (f32)
    per_row = io_per_row + scratch_per_row
    fixed = 2 * (F * H + 2 * F * H) * w_bytes + 4 * (H + 2 * F) + (1 << 20)
    budget_rows = (int(vmem_budget * 0.6) - fixed) // per_row
    tile = min(max_block_b, max(16, budget_rows))
    tile = min(tile, _round_up((B + 1) // 2, 16))     # >= 2 grid steps when B allows
    tile = max(16, _round_down(tile, 16))             # sublane-friendly for f32 & bf16
    if tile >= B:
        tile = B                                      # single full-array block (always valid)
    return tile


def adj_decoder(parent_feature, fused_params, *, max_block_b=32768):
    """parent_feature: [B, F]. fused_params: output of fuse_params(). Returns (left, right)."""
    B, F = parent_feature.shape
    H = fused_params["w1"].shape[1]
    assert fused_params["w2"].shape == (H, 2 * F)

    x_bytes = jnp.dtype(parent_feature.dtype).itemsize
    w_bytes = jnp.dtype(fused_params["w1"].dtype).itemsize
    vmem_budget = _vmem_budget_bytes()
    tile_b = _pick_tile_rows(B, F, H, x_bytes, w_bytes, vmem_budget, max_block_b)
    grid = (pl.cdiv(B, tile_b),)      # no batch-tail pad: Pallas masks the partial last block

    out_struct = jax.ShapeDtypeStruct((B, F), parent_feature.dtype)
    cost = pl.CostEstimate(
        flops=2 * B * H * 3 * F,                    # stage1 + fused stage2
        transcendentals=B * (H + 2 * F),            # tanh count
        bytes_accessed=B * 3 * F * x_bytes + 3 * F * H * w_bytes,
    )

    left, right = pl.pallas_call(
        adj_decoder_kernel,
        grid_spec=pltpu.PrefetchScalarGridSpec(
            num_scalar_prefetch=0,
            grid=grid,
            in_specs=[
                pl.BlockSpec((tile_b, F), lambda i: (i, 0)),   # x tile (pipelined)
                pl.BlockSpec((F, H), lambda i: (0, 0)),        # w1          (resident)
                pl.BlockSpec((1, H), lambda i: (0, 0)),        # b1 (f32)    (resident)
                pl.BlockSpec((H, 2 * F), lambda i: (0, 0)),    # wl||wr      (resident)
                pl.BlockSpec((1, 2 * F), lambda i: (0, 0)),    # bl||br (f32)(resident)
            ],
            out_specs=[
                pl.BlockSpec((tile_b, F), lambda i: (i, 0)),   # left
                pl.BlockSpec((tile_b, F), lambda i: (i, 0)),   # right
            ],
        ),
        out_shape=(out_struct, out_struct),
        compiler_params=pltpu.CompilerParams(
            dimension_semantics=("parallel",),
            vmem_limit_bytes=vmem_budget,
        ),
        cost_estimate=cost,
    )(parent_feature,
      fused_params["w1"], fused_params["b1"],
      fused_params["w2"], fused_params["b2"])
    return left, right


def fuse_params(params):
    """One-time fusion of the left/right projections: wl||wr -> [H, 2F] (no lane
    padding) and bl||br -> [1, 2F] kept in f32; b1 also kept in f32."""
    w2 = jnp.concatenate([params["wl"], params["wr"]], axis=1)
    b2 = jnp.concatenate([params["bl"], params["br"]], axis=1).astype(jnp.float32)
    return {"w1": params["w1"], "b1": params["b1"].astype(jnp.float32),
            "w2": w2, "b2": b2}


def init_params(key, feature_size, hidden_size, dtype=jnp.bfloat16):
    """Synthetic init mimicking nn.Linear's uniform(-1/sqrt(fan_in), +1/sqrt(fan_in)).
    Weights pre-transposed as [in, out]; biases kept in f32 (tiny, no rounding)."""
    ks = jax.random.split(key, 6)

    def lin(kw, kb, fan_in, fan_out):
        bound = 1.0 / jnp.sqrt(fan_in)
        w = jax.random.uniform(kw, (fan_in, fan_out), jnp.float32, -bound, bound)
        b = jax.random.uniform(kb, (1, fan_out), jnp.float32, -bound, bound)
        return w.astype(dtype), b

    w1, b1 = lin(ks[0], ks[1], feature_size, hidden_size)
    wl, bl = lin(ks[2], ks[3], hidden_size, feature_size)
    wr, br = lin(ks[4], ks[5], hidden_size, feature_size)
    return {"w1": w1, "b1": b1, "wl": wl, "bl": bl, "wr": wr, "br": br}


def adj_decoder_ref(x, p):
    """Pure-JAX f32 reference of the PyTorch forward (on the same rounded params)."""
    f32 = lambda a: a.astype(jnp.float32)
    h = jnp.tanh(f32(x) @ f32(p["w1"]) + f32(p["b1"]))
    left = jnp.tanh(h @ f32(p["wl"]) + f32(p["bl"]))
    right = jnp.tanh(h @ f32(p["wr"]) + f32(p["br"]))
    return left, right


if __name__ == "__main__":
    FEATURE_SIZE = 32   # feature_size in AdjDecoder.__init__
    HIDDEN_SIZE = 64    # hidden_size in AdjDecoder.__init__

    key = jax.random.PRNGKey(0)
    k_x, k_p, k_x2 = jax.random.split(key, 3)
    params = init_params(k_p, FEATURE_SIZE, HIDDEN_SIZE, dtype=jnp.bfloat16)
    fused = fuse_params(params)

    def check(batch, kx):
        x = jax.random.normal(kx, (batch, FEATURE_SIZE), jnp.float32).astype(jnp.bfloat16)
        left, right = adj_decoder(x, fused)
        jax.block_until_ready((left, right))
        left_ref, right_ref = adj_decoder_ref(x, params)
        assert left.shape == (batch, FEATURE_SIZE) and right.shape == (batch, FEATURE_SIZE)
        # bf16 activations/params with f32 accumulation; tanh outputs are bounded.
        assert jnp.allclose(left.astype(jnp.float32), left_ref, atol=3e-2, rtol=3e-2)
        assert jnp.allclose(right.astype(jnp.float32), right_ref, atol=3e-2, rtol=3e-2)

    check(8, k_x)     # single full-array block path
    check(40, k_x2)   # multi-step grid with a masked partial last block (no tail pad)

    print("KERNEL_OK")
</pallas_src>

<mosaic_0001>
module attributes {stable_mosaic.version = 11 : i64} {
  func.func @adj_decoder_kernel(%arg0: i32, %arg1: memref<8x32xbf16, #tpu.memory_space<vmem>>, %arg2: memref<32x64xbf16, #tpu.memory_space<vmem>>, %arg3: memref<1x64xf32, #tpu.memory_space<vmem>>, %arg4: memref<64x64xbf16, #tpu.memory_space<vmem>>, %arg5: memref<1x64xf32, #tpu.memory_space<vmem>>, %arg6: memref<8x32xbf16, #tpu.memory_space<vmem>>, %arg7: memref<8x32xbf16, #tpu.memory_space<vmem>>) attributes {dimension_semantics = [#tpu.dimension_semantics<parallel>], iteration_bounds = array<i64: 1>, scalar_prefetch = 0 : i64, scratch_operands = 0 : i64, tpu.core_type = #tpu.core_type<tc>, window_params = [{transform_indices = @transform_0, window_bounds = array<i64: 8, 32>}, {pipeline_mode = #tpu.pipeline_mode<synchronous>, transform_indices = @transform_1, window_bounds = array<i64: 32, 64>}, {pipeline_mode = #tpu.pipeline_mode<synchronous>, transform_indices = @transform_2, window_bounds = array<i64: 1, 64>}, {pipeline_mode = #tpu.pipeline_mode<synchronous>, transform_indices = @transform_3, window_bounds = array<i64: 64, 64>}, {pipeline_mode = #tpu.pipeline_mode<synchronous>, transform_indices = @transform_4, window_bounds = array<i64: 1, 64>}, {transform_indices = @transform_5, window_bounds = array<i64: 8, 32>}, {transform_indices = @transform_6, window_bounds = array<i64: 8, 32>}]} {
    %c0 = arith.constant 0 : index
    %c0_0 = arith.constant 0 : index
    %0 = vector.load %arg1[%c0, %c0_0] : memref<8x32xbf16, #tpu.memory_space<vmem>>, vector<8x32xbf16>
    %c0_1 = arith.constant 0 : index
    %c0_2 = arith.constant 0 : index
    %1 = vector.load %arg2[%c0_1, %c0_2] : memref<32x64xbf16, #tpu.memory_space<vmem>>, vector<32x64xbf16>
    %cst = arith.constant dense<0.000000e+00> : vector<8x64xf32>
    %2 = tpu.matmul %0, %1, %cst {dimension_numbers = #tpu.dot_dimension_numbers<[1], [0], [0], [1], [0, 0, 1, 1], [], []>} : vector<8x32xbf16>, vector<32x64xbf16>, vector<8x64xf32> -> vector<8x64xf32>
    %c0_3 = arith.constant 0 : index
    %c0_4 = arith.constant 0 : index
    %3 = vector.load %arg3[%c0_3, %c0_4] : memref<1x64xf32, #tpu.memory_space<vmem>>, vector<1x64xf32>
    %4 = vector.broadcast %3 : vector<1x64xf32> to vector<8x64xf32>
    %5 = arith.addf %2, %4 : vector<8x64xf32>
    %6 = math.tanh %5 : vector<8x64xf32>
    %7 = arith.truncf %6 : vector<8x64xf32> to vector<8x64xbf16>
    %c0_5 = arith.constant 0 : index
    %c0_6 = arith.constant 0 : index
    %8 = vector.load %arg4[%c0_5, %c0_6] : memref<64x64xbf16, #tpu.memory_space<vmem>>, vector<64x64xbf16>
    %cst_7 = arith.constant dense<0.000000e+00> : vector<8x64xf32>
    %9 = tpu.matmul %7, %8, %cst_7 {dimension_numbers = #tpu.dot_dimension_numbers<[1], [0], [0], [1], [0, 0, 1, 1], [], []>} : vector<8x64xbf16>, vector<64x64xbf16>, vector<8x64xf32> -> vector<8x64xf32>
    %c0_8 = arith.constant 0 : index
    %c0_9 = arith.constant 0 : index
    %10 = vector.load %arg5[%c0_8, %c0_9] : memref<1x64xf32, #tpu.memory_space<vmem>>, vector<1x64xf32>
    %11 = vector.broadcast %10 : vector<1x64xf32> to vector<8x64xf32>
    %12 = arith.addf %9, %11 : vector<8x64xf32>
    %13 = math.tanh %12 : vector<8x64xf32>
    %14 = vector.extract_strided_slice %13 {offsets = [0, 0], sizes = [8, 32], strides = [1, 1]} : vector<8x64xf32> to vector<8x32xf32>
    %15 = arith.truncf %14 : vector<8x32xf32> to vector<8x32xbf16>
    %c0_10 = arith.constant 0 : index
    %c0_11 = arith.constant 0 : index
    %16 = vector.load %arg6[%c0_10, %c0_11] : memref<8x32xbf16, #tpu.memory_space<vmem>>, vector<8x32xbf16>
    tpu.vector_store %arg6[%c0_10, %c0_11], %15 {strides = array<i32>} : memref<8x32xbf16, #tpu.memory_space<vmem>>, vector<8x32xbf16>,
    %17 = vector.extract_strided_slice %13 {offsets = [0, 32], sizes = [8, 32], strides = [1, 1]} : vector<8x64xf32> to vector<8x32xf32>
    %18 = arith.truncf %17 : vector<8x32xf32> to vector<8x32xbf16>
    %c0_12 = arith.constant 0 : index
    %c0_13 = arith.constant 0 : index
    %19 = vector.load %arg7[%c0_12, %c0_13] : memref<8x32xbf16, #tpu.memory_space<vmem>>, vector<8x32xbf16>
    tpu.vector_store %arg7[%c0_12, %c0_13], %18 {strides = array<i32>} : memref<8x32xbf16, #tpu.memory_space<vmem>>, vector<8x32xbf16>,
    return
  }
  func.func @transform_0(%arg0: i32) -> (i32, i32) {
    %c0_i32 = arith.constant 0 : i32
    %c0_i32_0 = arith.constant 0 : i32
    return %arg0, %c0_i32 : i32, i32
  }
  func.func @transform_1(%arg0: i32) -> (i32, i32) {
    %c0_i32 = arith.constant 0 : i32
    %c0_i32_0 = arith.constant 0 : i32
    %c0_i32_1 = arith.constant 0 : i32
    return %c0_i32, %c0_i32_0 : i32, i32
  }
  func.func @transform_2(%arg0: i32) -> (i32, i32) {
    %c0_i32 = arith.constant 0 : i32
    %c0_i32_0 = arith.constant 0 : i32
    %c0_i32_1 = arith.constant 0 : i32
    return %c0_i32, %c0_i32_0 : i32, i32
  }
  func.func @transform_3(%arg0: i32) -> (i32, i32) {
    %c0_i32 = arith.constant 0 : i32
    %c0_i32_0 = arith.constant 0 : i32
    %c0_i32_1 = arith.constant 0 : i32
    return %c0_i32, %c0_i32_0 : i32, i32
  }
  func.func @transform_4(%arg0: i32) -> (i32, i32) {
    %c0_i32 = arith.constant 0 : i32
    %c0_i32_0 = arith.constant 0 : i32
    %c0_i32_1 = arith.constant 0 : i32
    return %c0_i32, %c0_i32_0 : i32, i32
  }
  func.func @transform_5(%arg0: i32) -> (i32, i32) {
    %c0_i32 = arith.constant 0 : i32
    %c0_i32_0 = arith.constant 0 : i32
    return %arg0, %c0_i32 : i32, i32
  }
  func.func @transform_6(%arg0: i32) -> (i32, i32) {
    %c0_i32 = arith.constant 0 : i32
    %c0_i32_0 = arith.constant 0 : i32
    return %arg0, %c0_i32 : i32, i32
  }
}

</mosaic_0001>

<bundles_post_ra>
// kernel: tpu_custom_call.1
= control target key start
LH: loop header
LB: loop body
LE: loop exit
PB: predicated region body
PF: predicated region fallthrough
CT: control target
= control target key end

     0   :  { %12 = vsyncpa [#allocation3], 0  ;;  %s494_s0 = inlined_call_operand.hbm [shape: bf16[8,32], index: 0, kind: input, shape index: {}]   ;;  %s495_s1 = inlined_call_operand.hbm [shape: bf16[32,64], index: 1, kind: input, shape index: {}]   ;;  %s496_s2 = inlined_call_operand.vmem [shape: f32[1,64], index: 2, kind: input, shape index: {}]   ;;  %s497_s3 = inlined_call_operand.hbm [shape: bf16[64,64], index: 3, kind: input, shape index: {}]   ;;  %s498_s4 = inlined_call_operand.vmem [shape: f32[1,64], index: 4, kind: input, shape index: {}]   ;;  %s499_s5 = inlined_call_operand.hbm [shape: bf16[8,32], index: 5, kind: output, shape index: {0}]   ;;  %s500_s6 = inlined_call_operand.hbm [shape: bf16[8,32], index: 6, kind: output, shape index: {1}]  }
   0x1   :  { %13 = vsyncpa [#allocation6], 0 }
   0x2   :  { %14 = vsyncpa [#allocation4], 0 }
   0x3   :  { %15 = vsyncpa [#allocation10], 0  ;;  %s426_s21 = smov [#allocation5]  }
   0x4   :  { %s31_s22 = sshll.u32 %s426_s21, 4  ;;  %s32_s22 = int_to_ptr.vmem [resolvable:$true] %s31_s22 }
   0x5   :  { %s326_s23 = scalar_lea.vmem %s32_s22, 256  ;;  %p331_p1 = scmp.lt.s32.totalorder %s32_s22, %s32_s22 }
   0x6   :  { %p327_p0 = scmp.ne.s32.totalorder %s32_s22, %s326_s23  ;;  %p332_p2 = scmp.lt.s32.totalorder %s326_s23, %s326_s23 }
   0x8   :  { %p333_p3 = por %p332_p2, %p331_p1 }
   0xa   :  { %p334_p4 = pnand %p333_p3, %p327_p0 }
   0xc   :  { %337 = shalt.err (!%p334_p4)
}
   0xd   :  { %s427_s24 = smov 64   ;;  %s428_s25 = smov 4  }
   0xe   :  { %37 = dma.hbm_to_vmem [thread:$0]  %s495_s1, 256, %s32_s22, [#allocation6], %s427_s24, %s427_s24, %s428_s25  }
   0xf   :  { %s429_s28 = smov [#allocation2]   ;;  %s430_s30 = smov [#allocation7]  }
  0x10   :  { %s22_s29 = sshll.u32 %s429_s28, 4  ;;  %s45_s7 = sshll.u32 %s430_s30, 4  ;;  %s23_s29 = int_to_ptr.vmem [resolvable:$true] %s22_s29  ;;  %s46_s7 = int_to_ptr.vmem [resolvable:$true] %s45_s7 }
  0x11   :  { %s346_s8 = scalar_lea.vmem %s23_s29, 64  ;;  %p351_p6 = scmp.lt.s32.totalorder %s23_s29, %s23_s29 }
  0x12   :  { %p347_p5 = scmp.ne.s32.totalorder %s23_s29, %s346_s8  ;;  %p352_p7 = scmp.lt.s32.totalorder %s346_s8, %s346_s8 }
  0x14   :  { %p353_p8 = por %p352_p7, %p351_p6 }
  0x16   :  { %p354_p9 = pnand %p353_p8, %p347_p5 }
  0x18   :  { %357 = shalt.err (!%p354_p9)
}
  0x19   :  { %25 = dma.hbm_to_vmem [thread:$0]  %s494_s0, 64, %s23_s29, [#allocation3]  }
  0x1a   :  { %s366_s11 = scalar_lea.vmem %s46_s7, 512  ;;  %p371_p11 = scmp.lt.s32.totalorder %s46_s7, %s46_s7 }
  0x1b   :  { %p367_p10 = scmp.ne.s32.totalorder %s46_s7, %s366_s11  ;;  %p372_p12 = scmp.lt.s32.totalorder %s366_s11, %s366_s11 }
  0x1d   :  { %p373_p13 = por %p372_p12, %p371_p11 }
  0x1f   :  { %p374_p0 = pnand %p373_p13, %p367_p10 }
  0x21   :  { %377 = shalt.err (!%p374_p0)
}
  0x22   :  { %51 = dma.hbm_to_vmem [thread:$0]  %s497_s3, 512, %s46_s7, [#allocation6], %s427_s24, %s427_s24, %s428_s25  }
  0x23   :  { %418 = dma.done.wait [#allocation3], 64  }
  0x24   :  { %419 = vsyncadd [#allocation3], 4294967232 }
  0x25   :  { %420 = dma.done.wait [#allocation6], 768  }
  0x26   :  { %421 = vsyncadd [#allocation6], 4294966528  ;;  %v431_v0 = vmov 0.0   ;;  %vm432_vm0 = vmmov 0   ;;  %v308_v1 = vld [vmem:[#allocation5 + $0x8] sm:$0xff]   ;;  %v309_v2 = vld [vmem:[#allocation5] sm:$0xff]  }
  0x27   :  { %278 = vmatprep.subr.bf16.mxu0 %v431_v0  ;;  %282 = vmatprep.mubr.msk.bf16.mxu0 %vm432_vm0, %v431_v0  ;;  %v64_v3 = vld [vmem:[#allocation2] sm:$0xf]  ;;  %vm88_vm1 = vcmask 261120   ;;  %v310_v4 = vld [vmem:[#allocation7 + $0x18] sm:$0xff]   ;;  %v311_v5 = vld [vmem:[#allocation7 + $0x10] sm:$0xff]   ;;  %vm173_vm2 = vcmask 523264  }
  0x28   :  { %286 = vmatprep.subr.bf16.mxu1 %v431_v0  ;;  %294 = vmatprep.mubr.msk.bf16.mxu1 %vm432_vm0, %v431_v0  ;;  %v312_v6 = vld [vmem:[#allocation7 + $0x8] sm:$0xff]   ;;  %v313_v7 = vld [vmem:[#allocation7] sm:$0xff]   ;;  %vm219_vm3 = vcmask 257024   ;;  %s434_s16 = smov 96  }
  0x29   :  { %279 = vmatpush3.bf16.msra.mxu0 %v308_v1  ;;  %287 = vmatpush3.bf16.msra.mxu1 %v310_v4  ;;  %v258_v8 = vld [vmem:[%s496_s2] ss:$0 sm:$0xff]  ;;  %s433_s2 = smov [#allocation8]  }
  0x2a   :  { %280 = vmatprep.subr.bf16.mxu0 %v431_v0  ;;  %288 = vmatprep.subr.bf16.mxu1 %v431_v0  ;;  %v262_v16 = vld [vmem:[%s498_s4] ss:$0 sm:$0xff]  ;;  %s234_s15 = sshll.u32 %s433_s2, 4  ;;  %s235_s15 = int_to_ptr.vmem [resolvable:$true] %s234_s15 }
  0x2b   :  { %s378_s17 = scalar_lea.vmem %s235_s15, 64  ;;  %p383_p2 = scmp.lt.s32.totalorder %s235_s15, %s235_s15 }
  0x2c   :  { %p379_p1 = scmp.ne.s32.totalorder %s235_s15, %s378_s17  ;;  %p384_p3 = scmp.lt.s32.totalorder %s378_s17, %s378_s17 }
  0x2d   :  { %281 = vmatpush3.bf16.msra.mxu0 %v309_v2  ;;  %289 = vmatpush3.bf16.msra.mxu1 %v311_v5 }
  0x2e   :  { %290 = vmatprep.subr.bf16.mxu1 %v431_v0  ;;  %p385_p4 = por %p384_p3, %p383_p2 }
  0x30   :  { %283 = vmatmul.mubr.msk.bf16.vlgmr.msra.gmra.mxu0 %vm88_vm1, %v64_v3  ;;  %p386_p5 = pnand %p385_p4, %p379_p1 }
  0x31   :  { %291 = vmatpush3.bf16.msra.mxu1 %v312_v6 }
  0x32   :  { %292 = vmatprep.subr.bf16.mxu1 %v431_v0 }
  0x35   :  { %293 = vmatpush3.bf16.msra.mxu1 %v313_v7 }
  0xf0   :  { %v126_v9 = vpop.f32.mrf.mxu0 }
  0xf1   :  { %v127_v10 = vadd.f32 %v258_v8, %v126_v9 }
  0xf2   :  { %v284_v11 = vpop.f32.mrf.mxu0 }
  0xf3   :  { %314 = vtanh.f32 %v127_v10 }
  0xf4   :  { %v129_v12 = vpop.f32.mrf.mxu0 }
  0xf6   :  { %v285_v13 = vpop.f32.mrf.mxu0 }
 0x100   :  { %v315_v14 = vpop.eup %314 }
 0x101   :  { %v133_v15 = vpack.c.bf16 %v315_v14, %v315_v14 }
 0x103   :  { %295 = vmatmul.mubr.msk.bf16.vlgmr.msra.gmra.mxu1 %vm173_vm2, %v133_v15 }
 0x1c3   :  { %v211_v17 = vpop.f32.mrf.mxu1 }
 0x1c4   :  { %v212_v18 = vadd.f32 %v262_v16, %v211_v17 }
 0x1c5   :  { %v296_v19 = vpop.f32.mrf.mxu1 }
 0x1c6   :  { %316 = vtanh.f32 %v212_v18 }
 0x1c7   :  { %v214_v20 = vpop.f32.mrf.mxu1 }
 0x1c9   :  { %v297_v21 = vpop.f32.mrf.mxu1 }
 0x1d3   :  { %v317_v22 = vpop.eup %316 }
 0x1d4   :  { %v218_v23 = vpack.c.bf16 %v317_v22, %v317_v22 }
 0x1d6   :  { %224 = vrot.lane.b32.xlu0 %v218_v23, %s434_s16  ;;  %220 = vst.msk [vmem:[#allocation8] sm:$0xf] %vm219_vm3, %v218_v23 }
 0x1d7   :  { %389 = shalt.err (!%p386_p5)
}
 0x1d8   :  { %237 = dma.vmem_to_hbm [thread:$0]  %s235_s15, 64, %s499_s5, [#allocation4]  }
 0x1d9   :  { %s435_s19 = smov [#allocation9]  }
 0x1da   :  { %s244_s20 = sshll.u32 %s435_s19, 4  ;;  %s245_s20 = int_to_ptr.vmem [resolvable:$true] %s244_s20 }
 0x1db   :  { %s398_s21 = scalar_lea.vmem %s245_s20, 64  ;;  %p403_p7 = scmp.lt.s32.totalorder %s245_s20, %s245_s20 }
 0x1dc   :  { %p399_p6 = scmp.ne.s32.totalorder %s245_s20, %s398_s21  ;;  %p404_p8 = scmp.lt.s32.totalorder %s398_s21, %s398_s21 }
 0x1de   :  { %p405_p9 = por %p404_p8, %p403_p7 }
 0x1e0   :  { %p406_p10 = pnand %p405_p9, %p399_p6 }
 0x248   :  { %v225_v24 = vpop.permute.xlu0 %224 }
 0x249   :  { %227 = vst.msk [vmem:[#allocation9] sm:$0xf] %vm219_vm3, %v225_v24 }
 0x24a   :  { %409 = shalt.err (!%p406_p10)
}
 0x24b   :  { %247 = dma.vmem_to_hbm [thread:$0]  %s245_s20, 64, %s500_s6, [#allocation10]  }
 0x24c   :  { %422 = dma.done.wait [#allocation4], 64  }
 0x24d   :  { %423 = vsyncadd [#allocation4], 4294967232 }
 0x24e   :  { %424 = dma.done.wait [#allocation10], 64  }
 0x24f   :  { %425 = vsyncadd [#allocation10], 4294967232 }
 0x250   :  { %254 = vsyncpa [#allocation3], 1 }
 0x251   :  { %255 = vsyncpa [#allocation6], 1 }
 0x252   :  { %256 = vsyncpa [#allocation4], 1 }
 0x253   :  { %257 = vsyncpa [#allocation10], 1 }

</bundles_post_ra>
